<compile_context>
chip_gen: v7x
topology: tpu7x:2x2x1
jax: 0.10.0
libtpu: 0.0.40
codegen_flags: <defaults>
</compile_context>

<pallas_src>
import functools

import jax
import jax.numpy as jnp
import numpy as np
from jax.experimental import pallas as pl
from jax.experimental.pallas import tpu as pltpu

# ---------------- synthetic model constants (shapes from __init__) ------------
NV = 256                       # number of mesh vertices (u_ has 3*NV rows)
N_SHP = 199                    # shape basis dims
N_EXP = 29                     # expression basis dims
N_PARAM = 12 + N_SHP + N_EXP   # 240 -> selects the self.u / w_shp / w_exp branch
NCP = 32                       # number of control points
CP_NUM = 3 * NCP               # deform parameter dims (cp_num in the torch code)
K_BASIS = 1 + N_SHP + N_EXP    # 229: mean shape folded in as an extra basis column
K_PAD = 256                    # recon contraction dim padded to an MXU-friendly size
OFF_COL = K_BASIS              # padded column reused to fold +offset into the matmul
NCP_PAD = 40                   # deform contraction dim: 32 pts + 1 ones row, padded
MAX_TILE_B = 512               # batch rows per grid step (bf16 working set ~4 MiB)


def _round_up(x: int, m: int) -> int:
    return ((x + m - 1) // m) * m


def _choose_tile_b(b: int) -> int:
    """Batch rows per grid step: <= 512, multiple of 16 (bf16 sublane packing)."""
    if b <= MAX_TILE_B:
        return _round_up(max(b, 1), 16)
    n_tiles = -(-b // MAX_TILE_B)
    return _round_up(-(-b // n_tiles), 16)


# ---------------------------- fused Pallas kernel ------------------------------
def _fused_vertex_kernel(beta_ref, pre_ref, basis_ref, dm_ref,
                         out_r_ref, out_d_ref, *, z_shift):
    # Reconstruction rows of ONE coordinate: (tile_b, 3*K_PAD) @ (3*K_PAD, NV)
    # on the MXU, bf16 inputs / f32 accumulation. The per-batch pg mix and the
    # +offset are already folded into beta / basis.
    vert = jnp.dot(beta_ref[...], basis_ref[...],
                   preferred_element_type=jnp.float32)              # (tile_b, NV) f32
    out_r_ref[...] = vert
    if z_shift:
        # Grid axis 0 is the coordinate index; only z tiles pay the XLU lane-min.
        # NOTE: only correct because NV (lane axis) is never tiled — each row
        # holds all vertices of one batch element. Zero-padded batch rows give
        # min == 0, so they pass through unchanged and are sliced off outside.
        @pl.when(pl.program_id(0) == 2)
        def _():
            out_r_ref[...] = vert - jnp.min(vert, axis=-1, keepdims=True)
    # Deform rows: (tile_b, NCP_PAD) @ (NCP_PAD, NV); s*R mix and +offset folded.
    out_d_ref[...] = jnp.dot(pre_ref[...], dm_ref[...],
                             preferred_element_type=jnp.float32)


def _fused_pallas(beta, pre, basis_big, dm_aug, *, z_shift, tile_b):
    _, b_pad, kr = beta.shape           # kr = 3 * K_PAD = 768
    kd = pre.shape[-1]                  # NCP_PAD = 40
    nv = basis_big.shape[-1]            # 256
    # z_shift correctness relies on the vertex/lane axis being untiled.
    assert nv == NV and basis_big.shape == (kr, nv) and dm_aug.shape == (kd, nv)
    kernel = functools.partial(_fused_vertex_kernel, z_shift=z_shift)
    return pl.pallas_call(
        kernel,
        out_shape=(jax.ShapeDtypeStruct((3, b_pad, nv), jnp.float32),
                   jax.ShapeDtypeStruct((3, b_pad, nv), jnp.float32)),
        grid_spec=pltpu.PrefetchScalarGridSpec(
            num_scalar_prefetch=0,
            grid=(3, b_pad // tile_b),        # >= 3 steps -> v7x megacore always usable
            in_specs=[
                pl.BlockSpec((None, tile_b, kr), lambda c, i: (c, i, 0)),  # recon rows (beta, bf16)
                pl.BlockSpec((None, tile_b, kd), lambda c, i: (c, i, 0)),  # deform rows (pre, bf16)
                pl.BlockSpec((kr, nv), lambda c, i: (0, 0)),               # merged basis (grid-invariant)
                pl.BlockSpec((kd, nv), lambda c, i: (0, 0)),               # augmented deform matrix
            ],
            out_specs=(pl.BlockSpec((None, tile_b, nv), lambda c, i: (c, i, 0)),
                       pl.BlockSpec((None, tile_b, nv), lambda c, i: (c, i, 0))),
        ),
        compiler_params=pltpu.CompilerParams(
            dimension_semantics=("parallel", "parallel")),
    )(beta, pre, basis_big, dm_aug)


# ------------------------------ glue (plain JAX) -------------------------------
def _rot_from_axis_angle(axis_angle):
    """Batched Rodrigues formula, (N, 3) -> (N, 3, 3)."""
    theta = jnp.linalg.norm(axis_angle, axis=1, keepdims=True)      # (N, 1)
    k = axis_angle / jnp.maximum(theta, 1e-8)
    kx, ky, kz = k[:, 0], k[:, 1], k[:, 2]
    c = jnp.cos(theta[:, 0])
    s = jnp.sin(theta[:, 0])
    cc = 1.0 - c
    row0 = jnp.stack([c + kx * kx * cc, kx * ky * cc - kz * s, kx * kz * cc + ky * s], -1)
    row1 = jnp.stack([ky * kx * cc + kz * s, c + ky * ky * cc, ky * kz * cc - kx * s], -1)
    row2 = jnp.stack([kz * kx * cc - ky * s, kz * ky * cc + kx * s, c + kz * kz * cc], -1)
    return jnp.stack([row0, row1, row2], axis=1)


class VertexOutput:
    """JAX/Pallas port of the PyTorch VertexOutput module (240-param branch)."""

    def __init__(self, key):
        ks = jax.random.split(key, 7)
        self.param_mean = jax.random.normal(ks[0], (N_PARAM,), jnp.float32)
        self.param_std = jax.random.uniform(ks[1], (N_PARAM,), jnp.float32, 0.5, 1.5)
        self.u = 0.1 * jax.random.normal(ks[2], (3 * NV, 1), jnp.float32)
        self.w_shp = 0.1 * jax.random.normal(ks[3], (3 * NV, N_SHP), jnp.float32)
        self.w_exp = 0.1 * jax.random.normal(ks[4], (3 * NV, N_EXP), jnp.float32)
        self.deform_matrix = 0.1 * jax.random.normal(ks[5], (NV, NCP), jnp.float32)
        self.control_points = jax.random.normal(ks[6], (NCP, 3), jnp.float32)

        # ---- kernel-layout constants (parameter setup only, bf16 on the MXU) ----
        # Merged per-coordinate recon basis: basis_big[c2*K_PAD + k, v] = wa[3v+c2, k].
        wa = jnp.concatenate([self.u, self.w_shp, self.w_exp], axis=1)       # (3NV, K_BASIS)
        basis = jnp.transpose(wa.reshape(NV, 3, K_BASIS), (1, 2, 0))         # (3, K_BASIS, NV)
        basis = jnp.pad(basis, ((0, 0), (0, K_PAD - K_BASIS), (0, 0)))       # K: 229 -> 256
        basis = basis.at[0, OFF_COL, :].set(1.0)      # ones row: folds +offset into the matmul
        self.basis_big = basis.reshape(3 * K_PAD, NV).astype(jnp.bfloat16)   # (768, 256) bf16
        # Augmented deform matrix: dm_aug[j, v] = deform_matrix[v, j]; ones row at j=NCP.
        dm_aug = jnp.zeros((NCP_PAD, NV), jnp.float32)
        dm_aug = dm_aug.at[:NCP, :].set(self.deform_matrix.T)
        dm_aug = dm_aug.at[NCP, :].set(1.0)
        self.dm_aug = dm_aug.astype(jnp.bfloat16)                            # (40, 256) bf16

    # -- operand prep: tiny per-batch 3x3 math stays in plain JAX / XLA --
    def _recon_rows(self, gt_param, batch):
        """Coordinate-major recon LHS, (3, batch, 3*K_PAD) bf16."""
        gt = gt_param * self.param_std + self.param_mean
        p_ = gt[:, :12].reshape(batch, 3, 4)
        pg = p_[:, :, :3]                                            # (B, 3, 3)
        off = p_[:, :, 3]                                            # (B, 3)
        alpha = jnp.concatenate(
            [jnp.ones((batch, 1), jnp.float32), gt[:, 12:],
             jnp.zeros((batch, K_PAD - K_BASIS), jnp.float32)], axis=1)      # (B, K_PAD)
        beta = pg[:, :, :, None] * alpha[:, None, None, :]                   # (B, 3, 3, K_PAD)
        beta = beta.at[:, :, 0, OFF_COL].set(off)       # offset rides the ones basis row
        beta = jnp.transpose(beta, (1, 0, 2, 3)).reshape(3, batch, 3 * K_PAD)
        return beta.astype(jnp.bfloat16)

    def _deform_rows(self, param, batch):
        """Coordinate-major deform LHS, (3, batch, NCP_PAD) bf16."""
        pose = param[:, :7]
        s = jnp.abs(pose[:, 0])
        srot = s[:, None, None] * _rot_from_axis_angle(pose[:, 1:4])         # (B,3,3) = s*R
        off = pose[:, 4:7]                                                   # (B, 3)
        deform = param[:, 7:].reshape(batch, NCP, 3)
        pts = self.control_points[None] + deform                             # (B, NCP, 3)
        pre = jnp.einsum('bcd,bjd->bcj', srot, pts)                          # (B, 3, NCP)
        pre = jnp.concatenate(
            [pre, off[:, :, None],
             jnp.zeros((batch, 3, NCP_PAD - NCP - 1), jnp.float32)], axis=2)  # (B, 3, 40)
        return jnp.transpose(pre, (1, 0, 2)).astype(jnp.bfloat16)            # (3, B, 40)

    def __call__(self, inp, target, z_shift=False, coords_first=False):
        batch = target.shape[0]
        beta = self._recon_rows(target, batch)
        pre = self._deform_rows(inp, batch)

        tile_b = _choose_tile_b(batch)
        b_pad = _round_up(batch, tile_b)
        if b_pad != batch:
            # Zero padding only (required: padded rows must stay all-zero for z_shift).
            beta = jnp.pad(beta, ((0, 0), (0, b_pad - batch), (0, 0)))
            pre = jnp.pad(pre, ((0, 0), (0, b_pad - batch), (0, 0)))

        out_r, out_d = _fused_pallas(beta, pre, self.basis_big, self.dm_aug,
                                     z_shift=bool(z_shift), tile_b=tile_b)
        out_r = out_r[:, :batch, :]                                   # (3, B, NV)
        out_d = out_d[:, :batch, :]

        if coords_first:
            # Lane-friendly (B, 3, NV) layout — avoids the lane-sparse last-dim-3 relayout.
            return (jnp.transpose(out_r, (1, 0, 2)).astype(jnp.float32),
                    jnp.transpose(out_d, (1, 0, 2)).astype(jnp.float32))
        # Module contract is (B, NV, 3).
        target_vert = jnp.transpose(out_r, (1, 2, 0)).astype(jnp.float32)
        deformed_vert = jnp.transpose(out_d, (1, 2, 0)).astype(jnp.float32)
        return target_vert, deformed_vert


# ------------------------------ pure-JAX reference -----------------------------
def _reference_forward(m, inp, target, z_shift=False):
    n = target.shape[0]
    gt = target * m.param_std + m.param_mean
    p_ = gt[:, :12].reshape(n, 3, 4)
    pg, offg = p_[:, :, :3], p_[:, :, 3:].reshape(n, 3, 1)
    a_shp = gt[:, 12:12 + N_SHP].reshape(n, N_SHP, 1)
    a_exp = gt[:, 12 + N_SHP:].reshape(n, N_EXP, 1)
    v = m.u[None] + m.w_shp[None] @ a_shp + m.w_exp[None] @ a_exp    # (n, 3NV, 1)
    v = jnp.transpose(v.reshape(n, NV, 3), (0, 2, 1))                # (n, 3, NV)
    tv = jnp.transpose(pg @ v + offg, (0, 2, 1))                     # (n, NV, 3)
    if z_shift:
        tv = tv.at[:, :, 2].add(-jnp.min(tv[:, :, 2], axis=1, keepdims=True))

    pose = inp[:, :7]
    s = jnp.abs(pose[:, 0]).reshape(n, 1)
    rot = s[:, :, None] * _rot_from_axis_angle(pose[:, 1:4])
    off = pose[:, 4:7].reshape(n, 3, 1)
    deform = inp[:, 7:].reshape(n, NCP, 3)
    d = m.deform_matrix[None] @ (m.control_points[None] + deform)    # (n, NV, 3)
    dv = rot @ jnp.transpose(d, (0, 2, 1)) + off
    return tv.astype(jnp.float32), jnp.transpose(dv, (0, 2, 1)).astype(jnp.float32)


if __name__ == "__main__":
    key = jax.random.PRNGKey(0)
    k_mod, k_in, k_tgt = jax.random.split(key, 3)

    module = VertexOutput(k_mod)
    N = 2
    inp = jax.random.normal(k_in, (N, 7 + CP_NUM), jnp.float32)       # (2, 103)
    target = jax.random.normal(k_tgt, (N, N_PARAM), jnp.float32)      # (2, 240)

    # whole forward (operand prep + fused Pallas kernel) under a single jit
    fwd = jax.jit(lambda i, t: module(i, t, z_shift=False))
    target_vert, deformed_vert = fwd(inp, target)
    jax.block_until_ready((target_vert, deformed_vert))

    fwd_zs = jax.jit(lambda i, t: module(i, t, z_shift=True))
    target_vert_zs, _ = fwd_zs(inp, target)
    jax.block_until_ready(target_vert_zs)

    with jax.default_matmul_precision("highest"):
        ref_tv, ref_dv = _reference_forward(module, inp, target, z_shift=False)
        ref_tv_zs, _ = _reference_forward(module, inp, target, z_shift=True)
        jax.block_until_ready((ref_tv, ref_dv, ref_tv_zs))

    assert target_vert.shape == (N, NV, 3) and target_vert.dtype == jnp.float32
    assert deformed_vert.shape == (N, NV, 3) and deformed_vert.dtype == jnp.float32
    # bf16 operands against an f32 "highest"-precision reference: values are O(5),
    # bf16 quantization gives ~0.3% relative error -> atol 1e-1 / rtol 5e-2.
    np.testing.assert_allclose(np.asarray(target_vert), np.asarray(ref_tv),
                               rtol=5e-2, atol=1e-1)
    np.testing.assert_allclose(np.asarray(deformed_vert), np.asarray(ref_dv),
                               rtol=5e-2, atol=1e-1)
    np.testing.assert_allclose(np.asarray(target_vert_zs), np.asarray(ref_tv_zs),
                               rtol=5e-2, atol=1e-1)
    print("KERNEL_OK")
</pallas_src>

<mosaic_0001>
module attributes {stable_mosaic.version = 11 : i64} {
  func.func @_fused_vertex_kernel(%arg0: i32, %arg1: i32, %arg2: memref<1x16x768xbf16, #tpu.memory_space<vmem>>, %arg3: memref<1x16x40xbf16, #tpu.memory_space<vmem>>, %arg4: memref<768x256xbf16, #tpu.memory_space<vmem>>, %arg5: memref<40x256xbf16, #tpu.memory_space<vmem>>, %arg6: memref<1x16x256xf32, #tpu.memory_space<vmem>>, %arg7: memref<1x16x256xf32, #tpu.memory_space<vmem>>) attributes {dimension_semantics = [#tpu.dimension_semantics<parallel>, #tpu.dimension_semantics<parallel>], iteration_bounds = array<i64: 3, 1>, scalar_prefetch = 0 : i64, scratch_operands = 0 : i64, tpu.core_type = #tpu.core_type<tc>, window_params = [{transform_indices = @transform_0, window_bounds = array<i64: 1, 16, 768>}, {transform_indices = @transform_1, window_bounds = array<i64: 1, 16, 40>}, {pipeline_mode = #tpu.pipeline_mode<synchronous>, transform_indices = @transform_2, window_bounds = array<i64: 768, 256>}, {pipeline_mode = #tpu.pipeline_mode<synchronous>, transform_indices = @transform_3, window_bounds = array<i64: 40, 256>}, {transform_indices = @transform_4, window_bounds = array<i64: 1, 16, 256>}, {transform_indices = @transform_5, window_bounds = array<i64: 1, 16, 256>}]} {
    %c0 = arith.constant 0 : index
    %c0_0 = arith.constant 0 : index
    %c0_1 = arith.constant 0 : index
    %0 = vector.load %arg2[%c0, %c0_0, %c0_1] : memref<1x16x768xbf16, #tpu.memory_space<vmem>>, vector<1x16x768xbf16>
    %1 = vector.shape_cast %0 : vector<1x16x768xbf16> to vector<16x768xbf16>
    %c0_2 = arith.constant 0 : index
    %c0_3 = arith.constant 0 : index
    %2 = vector.load %arg4[%c0_2, %c0_3] : memref<768x256xbf16, #tpu.memory_space<vmem>>, vector<768x256xbf16>
    %cst = arith.constant dense<0.000000e+00> : vector<16x256xf32>
    %3 = tpu.matmul %1, %2, %cst {dimension_numbers = #tpu.dot_dimension_numbers<[1], [0], [0], [1], [0, 0, 1, 1], [], []>} : vector<16x768xbf16>, vector<768x256xbf16>, vector<16x256xf32> -> vector<16x256xf32>
    %c0_4 = arith.constant 0 : index
    %c0_5 = arith.constant 0 : index
    %c0_6 = arith.constant 0 : index
    %4 = vector.load %arg6[%c0_4, %c0_5, %c0_6] : memref<1x16x256xf32, #tpu.memory_space<vmem>>, vector<1x16x256xf32>
    %5 = vector.shape_cast %4 : vector<1x16x256xf32> to vector<16x256xf32>
    %6 = vector.shape_cast %3 : vector<16x256xf32> to vector<1x16x256xf32>
    tpu.vector_store %arg6[%c0_4, %c0_5, %c0_6], %6 {strides = array<i32>} : memref<1x16x256xf32, #tpu.memory_space<vmem>>, vector<1x16x256xf32>,
    %c0_7 = arith.constant 0 : index
    %c0_8 = arith.constant 0 : index
    %c0_9 = arith.constant 0 : index
    %7 = vector.load %arg3[%c0_7, %c0_8, %c0_9] : memref<1x16x40xbf16, #tpu.memory_space<vmem>>, vector<1x16x40xbf16>
    %8 = vector.shape_cast %7 : vector<1x16x40xbf16> to vector<16x40xbf16>
    %c0_10 = arith.constant 0 : index
    %c0_11 = arith.constant 0 : index
    %9 = vector.load %arg5[%c0_10, %c0_11] : memref<40x256xbf16, #tpu.memory_space<vmem>>, vector<40x256xbf16>
    %cst_12 = arith.constant dense<0.000000e+00> : vector<16x256xf32>
    %10 = tpu.matmul %8, %9, %cst_12 {dimension_numbers = #tpu.dot_dimension_numbers<[1], [0], [0], [1], [0, 0, 1, 1], [], []>} : vector<16x40xbf16>, vector<40x256xbf16>, vector<16x256xf32> -> vector<16x256xf32>
    %c0_13 = arith.constant 0 : index
    %c0_14 = arith.constant 0 : index
    %c0_15 = arith.constant 0 : index
    %11 = vector.load %arg7[%c0_13, %c0_14, %c0_15] : memref<1x16x256xf32, #tpu.memory_space<vmem>>, vector<1x16x256xf32>
    %12 = vector.shape_cast %11 : vector<1x16x256xf32> to vector<16x256xf32>
    %13 = vector.shape_cast %10 : vector<16x256xf32> to vector<1x16x256xf32>
    tpu.vector_store %arg7[%c0_13, %c0_14, %c0_15], %13 {strides = array<i32>} : memref<1x16x256xf32, #tpu.memory_space<vmem>>, vector<1x16x256xf32>,
    return
  }
  func.func @transform_0(%arg0: i32, %arg1: i32) -> (i32, i32, i32) {
    %c0_i32 = arith.constant 0 : i32
    %c0_i32_0 = arith.constant 0 : i32
    return %arg0, %arg1, %c0_i32 : i32, i32, i32
  }
  func.func @transform_1(%arg0: i32, %arg1: i32) -> (i32, i32, i32) {
    %c0_i32 = arith.constant 0 : i32
    %c0_i32_0 = arith.constant 0 : i32
    return %arg0, %arg1, %c0_i32 : i32, i32, i32
  }
  func.func @transform_2(%arg0: i32, %arg1: i32) -> (i32, i32) {
    %c0_i32 = arith.constant 0 : i32
    %c0_i32_0 = arith.constant 0 : i32
    %c0_i32_1 = arith.constant 0 : i32
    return %c0_i32, %c0_i32_0 : i32, i32
  }
  func.func @transform_3(%arg0: i32, %arg1: i32) -> (i32, i32) {
    %c0_i32 = arith.constant 0 : i32
    %c0_i32_0 = arith.constant 0 : i32
    %c0_i32_1 = arith.constant 0 : i32
    return %c0_i32, %c0_i32_0 : i32, i32
  }
  func.func @transform_4(%arg0: i32, %arg1: i32) -> (i32, i32, i32) {
    %c0_i32 = arith.constant 0 : i32
    %c0_i32_0 = arith.constant 0 : i32
    return %arg0, %arg1, %c0_i32 : i32, i32, i32
  }
  func.func @transform_5(%arg0: i32, %arg1: i32) -> (i32, i32, i32) {
    %c0_i32 = arith.constant 0 : i32
    %c0_i32_0 = arith.constant 0 : i32
    return %arg0, %arg1, %c0_i32 : i32, i32, i32
  }
}

</mosaic_0001>

<bundles_post_ra>
// kernel: _lambda_.1
= control target key start
LH: loop header
LB: loop body
LE: loop exit
PB: predicated region body
PF: predicated region fallthrough
CT: control target
= control target key end

     0   :  { %s1721_s18 = smov 0   ;;  %s1723_s19 = smov 0   ;;  %s2083_s0 = inlined_call_operand.vmem [shape: bf16[3,16,768], index: 0, kind: input, shape index: {}]   ;;  %s2084_s1 = inlined_call_operand.vmem [shape: bf16[3,16,40], index: 1, kind: input, shape index: {}]   ;;  %s2085_s2 = inlined_call_operand.vmem [shape: bf16[768,256], index: 2, kind: input, shape index: {}]   ;;  %s2086_s3 = inlined_call_operand.vmem [shape: bf16[40,256], index: 3, kind: input, shape index: {}]   ;;  %s2087_s4 = inlined_call_operand.vmem [shape: f32[3,16,256], index: 4, kind: output, shape index: {0}]   ;;  %s2088_s5 = inlined_call_operand.vmem [shape: f32[3,16,256], index: 5, kind: output, shape index: {1}]  }
   0x1   :  { %s1725_s20 = smov 0  }
   0x2 LB: > { %s28_s21 = sadd.s32 1, %s1684_s19  ;;  %p1346_p0 = scmp.ge.s32.totalorder %s1688_s20, 1  ;;  %s1688_s20 = sphi %s1725_s20, %s16_s20   ;;  %s1684_s19 = sphi %s1723_s19, %s2090_s19   ;;  %s1680_s18 = sphi %s1721_s18, %s2089_s18  }
   0x3   : > { %p30_p1 = scmp.ge.s32.totalorder %s28_s21, 3  ;;  %p231_p2 = scmp.lt.s32.totalorder %s1688_s20, 4 }
   0x5   : > { %s2092_s21 = smov (%p30_p1, %s28_s21), 0  ;;  %p232_p3 = pnand %p1346_p0, %p231_p2 }
   0x6   : > { %v1504_v0 = vld [vmem:[%s2085_s2 + $0x104] ss:$8 sps:$4 sm:$0xff] (!%p232_p3)   ;;  %v1506_v1 = vld [vmem:[%s2085_s2 + $0x100] ss:$8 sps:$4 sm:$0xff] (!%p232_p3)   ;;  %v1507_v2 = vld [vmem:[%s2085_s2 + $0x114] ss:$8 sps:$4 sm:$0xff] (!%p232_p3)  }
   0x7   : > { %235 = sbr.rel (%p232_p3) target bundleno = 353 (0x161), region = 36  ;;  %987 = vmatprep.subr.bf16.mxu0 (!%p232_p3), %v1504_v0  ;;  %v1509_v3 = vld [vmem:[%s2085_s2 + $0x110] ss:$8 sps:$4 sm:$0xff] (!%p232_p3)   ;;  %v1510_v4 = vld [vmem:[%s2085_s2 + $0x124] ss:$8 sps:$4 sm:$0xff] (!%p232_p3)   ;;  %p289_p4 = scmp.lt.s32.totalorder (!%p232_p3), %s1680_s18, 2 }
   0x8   : > { %988 = vmatpush1.bf16.msra.mxu0 (!%p232_p3), %v1506_v1  ;;  %v1512_v5 = vld [vmem:[%s2085_s2 + $0x120] ss:$8 sps:$4 sm:$0xff] (!%p232_p3)   ;;  %v1513_v6 = vld [vmem:[%s2085_s2 + $0x134] ss:$8 sps:$4 sm:$0xff] (!%p232_p3)   ;;  %v1515_v7 = vld [vmem:[%s2085_s2 + $0x130] ss:$8 sps:$4 sm:$0xff] (!%p232_p3)  }
   0x9   : > { %989 = vmatprep.subr.bf16.mxu0 (!%p232_p3), %v1507_v2  ;;  %v1516_v8 = vld [vmem:[%s2085_s2 + $0x144] ss:$8 sps:$4 sm:$0xff] (!%p232_p3)   ;;  %v1518_v9 = vld [vmem:[%s2085_s2 + $0x140] ss:$8 sps:$4 sm:$0xff] (!%p232_p3)   ;;  %v1519_v10 = vld [vmem:[%s2085_s2 + $0x154] ss:$8 sps:$4 sm:$0xff] (!%p232_p3)  }
   0xa   : > { %v1543_v11 = vld [vmem:[%s2085_s2 + $0x4] ss:$8 sps:$4 sm:$0xff] (!%p232_p3)   ;;  %v1545_v12 = vld [vmem:[%s2085_s2] ss:$8 sps:$4 sm:$0xff] (!%p232_p3)   ;;  %v1521_v13 = vld [vmem:[%s2085_s2 + $0x150] ss:$8 sps:$4 sm:$0xff] (!%p232_p3)  }
   0xb   : > { %v1522_v14 = vld [vmem:[%s2085_s2 + $0x164] ss:$8 sps:$4 sm:$0xff] (!%p232_p3)   ;;  %944 = vmatprep.subr.bf16.mxu1 (!%p232_p3), %v1543_v11  ;;  %v1549_v15 = vld [vmem:[%s2085_s2 + $0x14] ss:$8 sps:$4 sm:$0xff] (!%p232_p3)   ;;  %v1551_v16 = vld [vmem:[%s2085_s2 + $0x10] ss:$8 sps:$4 sm:$0xff] (!%p232_p3)  }
   0xc   : > { %990 = vmatpush1.bf16.msra.mxu0 (!%p232_p3), %v1509_v3  ;;  %945 = vmatpush1.bf16.msra.mxu1 (!%p232_p3), %v1545_v12  ;;  %v1524_v17 = vld [vmem:[%s2085_s2 + $0x160] ss:$8 sps:$4 sm:$0xff] (!%p232_p3)   ;;  %v1555_v18 = vld [vmem:[%s2085_s2 + $0x24] ss:$8 sps:$4 sm:$0xff] (!%p232_p3)   ;;  %v1525_v19 = vld [vmem:[%s2085_s2 + $0x174] ss:$8 sps:$4 sm:$0xff] (!%p232_p3)  }
   0xd   : > { %991 = vmatprep.subr.bf16.mxu0 (!%p232_p3), %v1510_v4  ;;  %946 = vmatprep.subr.bf16.mxu1 (!%p232_p3), %v1549_v15  ;;  %v1557_v20 = vld [vmem:[%s2085_s2 + $0x20] ss:$8 sps:$4 sm:$0xff] (!%p232_p3)   ;;  %v1561_v21 = vld [vmem:[%s2085_s2 + $0x34] ss:$8 sps:$4 sm:$0xff] (!%p232_p3)   ;;  %v1527_v22 = vld [vmem:[%s2085_s2 + $0x170] ss:$8 sps:$4 sm:$0xff] (!%p232_p3)  }
   0xe   : > { %s2094_s18 = smov (!%p289_p4, %s1680_s18), 2  ;;  %v1528_v24 = vld [vmem:[%s2085_s2 + $0x184] ss:$8 sps:$4 sm:$0xff]   ;;  %v1563_v25 = vld [vmem:[%s2085_s2 + $0x30] ss:$8 sps:$4 sm:$0xff]   ;;  %vm1118_vm0 = vcmask 1043456  }
   0xf   : > { %s1478_s8 = smul.u32 48, %s2094_s18  ;;  %v1570_v26 = vld [vmem:[%s2085_s2 + $0x44] ss:$8 sps:$4 sm:$0xff]   ;;  %v1530_v27 = vld [vmem:[%s2085_s2 + $0x180] ss:$8 sps:$4 sm:$0xff]   ;;  %s1467_s30 = sshll.u32 %s2094_s18, 3 }
  0x10   : > { %992 = vmatpush1.bf16.msra.mxu0 %v1512_v5  ;;  %947 = vmatpush1.bf16.msra.mxu1 %v1551_v16  ;;  %v1531_v28 = vld [vmem:[%s2085_s2 + $0x194] ss:$8 sps:$4 sm:$0xff]   ;;  %v1572_v29 = vld [vmem:[%s2085_s2 + $0x40] ss:$8 sps:$4 sm:$0xff]   ;;  %v1533_v31 = vld [vmem:[%s2085_s2 + $0x190] ss:$8 sps:$4 sm:$0xff]   ;;  %s1957_s14 = scalar_lea.vmem %s2084_s1, %s1467_s30 }
  0x11   : > { %993 = vmatprep.subr.bf16.mxu0 %v1513_v6  ;;  %s1809_s23 = scalar_lea.vmem %s2083_s0, %s1478_s8  ;;  %948 = vmatprep.subr.bf16.mxu1 %v1555_v18  ;;  %v1576_v30 = vld [vmem:[%s2085_s2 + $0x54] ss:$8 sps:$4 sm:$0xff]   ;;  %v1534_v32 = vld [vmem:[%s2085_s2 + $0x1a4] ss:$8 sps:$4 sm:$0xff]   ;;  %v1578_v33 = vld [vmem:[%s2085_s2 + $0x50] ss:$8 sps:$4 sm:$0xff]  }
  0x12   : > { %v1566_v23 = vld [vmem:[%s1809_s23 + $0xc] ss:$24 sps:$4 sm:$0xff]   ;;  %v1536_v35 = vld [vmem:[%s2085_s2 + $0x1a0] ss:$8 sps:$4 sm:$0xff]   ;;  %v1537_v36 = vld [vmem:[%s2085_s2 + $0x1b4] ss:$8 sps:$4 sm:$0xff]  }
  0x13   : > { %1019 = vmatprep.mubr.bf16.mxu0 %v1566_v23  ;;  %v1582_v34 = vld [vmem:[%s2085_s2 + $0x64] ss:$8 sps:$4 sm:$0xff]   ;;  %v1584_v37 = vld [vmem:[%s2085_s2 + $0x60] ss:$8 sps:$4 sm:$0xff]   ;;  %v1588_v38 = vld [vmem:[%s2085_s2 + $0x74] ss:$8 sps:$4 sm:$0xff]  }
  0x14   : > { %994 = vmatpush1.bf16.msra.mxu0 %v1515_v7  ;;  %949 = vmatpush1.bf16.msra.mxu1 %v1557_v20  ;;  %v1539_v39 = vld [vmem:[%s2085_s2 + $0x1b0] ss:$8 sps:$4 sm:$0xff]   ;;  %v1540_v40 = vld [vmem:[%s2085_s2 + $0x1c4] ss:$8 sps:$4 sm:$0xff]   ;;  %v1542_v43 = vld [vmem:[%s2085_s2 + $0x1c0] ss:$8 sps:$4 sm:$0xff]  }
  0x15   : > { %995 = vmatprep.subr.bf16.mxu0 %v1516_v8  ;;  %950 = vmatprep.subr.bf16.mxu1 %v1561_v21  ;;  %v1590_v41 = vld [vmem:[%s2085_s2 + $0x70] ss:$8 sps:$4 sm:$0xff]   ;;  %v1594_v42 = vld [vmem:[%s2085_s2 + $0x84] ss:$8 sps:$4 sm:$0xff]   ;;  %v1546_v44 = vld [vmem:[%s2085_s2 + $0x1d4] ss:$8 sps:$4 sm:$0xff]  }
  0x16   : > { %v1596_v45 = vld [vmem:[%s2085_s2 + $0x80] ss:$8 sps:$4 sm:$0xff]   ;;  %v1600_v46 = vld [vmem:[%s2085_s2 + $0x94] ss:$8 sps:$4 sm:$0xff]   ;;  %v1548_v47 = vld [vmem:[%s2085_s2 + $0x1d0] ss:$8 sps:$4 sm:$0xff]  }
  0x17   : > { %v1552_v48 = vld [vmem:[%s2085_s2 + $0x1e4] ss:$8 sps:$4 sm:$0xff]   ;;  %v1602_v49 = vld [vmem:[%s2085_s2 + $0x90] ss:$8 sps:$4 sm:$0xff]   ;;  %v1554_v51 = vld [vmem:[%s2085_s2 + $0x1e0] ss:$8 sps:$4 sm:$0xff]  }
  0x18   : > { %996 = vmatpush1.bf16.msra.mxu0 %v1518_v9  ;;  %951 = vmatpush1.bf16.msra.mxu1 %v1563_v25  ;;  %v1606_v50 = vld [vmem:[%s2085_s2 + $0xa4] ss:$8 sps:$4 sm:$0xff]   ;;  %v1558_v52 = vld [vmem:[%s2085_s2 + $0x1f4] ss:$8 sps:$4 sm:$0xff]   ;;  %v1608_v53 = vld [vmem:[%s2085_s2 + $0xa0] ss:$8 sps:$4 sm:$0xff]  }
  0x19   : > { %997 = vmatprep.subr.bf16.mxu0 %v1519_v10  ;;  %952 = vmatprep.subr.bf16.mxu1 %v1570_v26  ;;  %v1612_v54 = vld [vmem:[%s2085_s2 + $0xb4] ss:$8 sps:$4 sm:$0xff]   ;;  %v1560_v55 = vld [vmem:[%s2085_s2 + $0x1f0] ss:$8 sps:$4 sm:$0xff]   ;;  %v1564_v56 = vld [vmem:[%s1809_s23 + $0x8] ss:$24 sps:$4 sm:$0xff]  }
  0x1a   : > { %v1569_v57 = vld [vmem:[%s2085_s2 + $0x204] ss:$8 sps:$4 sm:$0xff]   ;;  %v1614_v58 = vld [vmem:[%s2085_s2 + $0xb0] ss:$8 sps:$4 sm:$0xff]   ;;  %v1567_v61 = vld [vmem:[%s2085_s2 + $0x200] ss:$8 sps:$4 sm:$0xff]  }
  0x1b   : > { %v1618_v59 = vld [vmem:[%s2085_s2 + $0xc4] ss:$8 sps:$4 sm:$0xff]   ;;  %v1575_v62 = vld [vmem:[%s2085_s2 + $0x214] ss:$8 sps:$4 sm:$0xff]   ;;  %v1620_v63 = vld [vmem:[%s2085_s2 + $0xc0] ss:$8 sps:$4 sm:$0xff]  }
  0x1c   : > { %998 = vmatpush1.bf16.msra.mxu0 %v1521_v13  ;;  %953 = vmatpush1.bf16.msra.mxu1 %v1572_v29  ;;  %v1644_v60 = vld [vmem:[%s1809_s23 + $0x4] ss:$24 sps:$4 sm:$0xff]   ;;  %v1573_v1 = vld [vmem:[%s2085_s2 + $0x210] ss:$8 sps:$4 sm:$0xff]   ;;  %v1664_v5 = vld [vmem:[%s1809_s23 + $0x14] ss:$24 sps:$4 sm:$0xff]  }
  0x1d   : > { %999 = vmatprep.subr.bf16.mxu0 %v1522_v14  ;;  %954 = vmatprep.subr.bf16.mxu1 %v1576_v30  ;;  %v1624_v0 = vld [vmem:[%s2085_s2 + $0xd4] ss:$8 sps:$4 sm:$0xff]   ;;  %v1581_v2 = vld [vmem:[%s2085_s2 + $0x224] ss:$8 sps:$4 sm:$0xff]   ;;  %v1626_v3 = vld [vmem:[%s2085_s2 + $0xd0] ss:$8 sps:$4 sm:$0xff]  }
  0x1e   : > { %976 = vmatprep.mubr.bf16.mxu1 %v1644_v60  ;;  %v1630_v4 = vld [vmem:[%s2085_s2 + $0xe4] ss:$8 sps:$4 sm:$0xff]   ;;  %v1579_v6 = vld [vmem:[%s2085_s2 + $0x220] ss:$8 sps:$4 sm:$0xff]   ;;  %v1587_v7 = vld [vmem:[%s2085_s2 + $0x234] ss:$8 sps:$4 sm:$0xff]  }
  0x1f   : > { %v1632_v8 = vld [vmem:[%s2085_s2 + $0xe0] ss:$8 sps:$4 sm:$0xff]   ;;  %v1636_v9 = vld [vmem:[%s2085_s2 + $0xf4] ss:$8 sps:$4 sm:$0xff]   ;;  %v1585_v10 = vld [vmem:[%s2085_s2 + $0x230] ss:$8 sps:$4 sm:$0xff]  }
  0x20   : > { %1000 = vmatpush1.bf16.msra.mxu0 %v1524_v17  ;;  %955 = vmatpush1.bf16.msra.mxu1 %v1578_v33  ;;  %v1593_v11 = vld [vmem:[%s2085_s2 + $0x244] ss:$8 sps:$4 sm:$0xff]   ;;  %v1638_v12 = vld [vmem:[%s2085_s2 + $0xf0] ss:$8 sps:$4 sm:$0xff]   ;;  %v1591_v14 = vld [vmem:[%s2085_s2 + $0x240] ss:$8 sps:$4 sm:$0xff]  }
  0x21   : > { %1001 = vmatprep.subr.bf16.mxu0 %v1525_v19  ;;  %956 = vmatprep.subr.bf16.mxu1 %v1582_v34  ;;  %v1647_v13 = vld [vmem:[%s2086_s3 + $0x4] ss:$8 sps:$4 sm:$0xff]   ;;  %v1599_v15 = vld [vmem:[%s2085_s2 + $0x254] ss:$8 sps:$4 sm:$0xff]   ;;  %v1642_v16 = vld [vmem:[%s1809_s23] ss:$24 sps:$4 sm:$0xff]  }
  0x22   : > { %v1645_v17 = vld [vmem:[%s2086_s3] ss:$8 sps:$4 sm:$0xff]   ;;  %v1653_v18 = vld [vmem:[%s2086_s3 + $0x14] ss:$8 sps:$4 sm:$0xff]   ;;  %v1597_v19 = vld [vmem:[%s2085_s2 + $0x250] ss:$8 sps:$4 sm:$0xff]  }
  0x23   : > { %v1083_v20 = vld [vmem:[%s2086_s3 + $0x20] sm:$0xff]  ;;  %v1690_v23 = vmov 0   ;;  %v1609_v29 = vld [vmem:[%s2085_s2 + $0x270] ss:$8 sps:$4 sm:$0xff]   ;;  %vm1114_vm1 = vcmask 326656   ;;  %s1468_s6 = sshll.u32 %s2094_s18, 5 }
  0x24   : > { %1002 = vmatpush1.bf16.msra.mxu0 %v1527_v22  ;;  %957 = vmatpush1.bf16.msra.mxu1 %v1584_v37  ;;  %v1605_v21 = vld [vmem:[%s2085_s2 + $0x264] ss:$8 sps:$4 sm:$0xff]   ;;  %v1651_v22 = vld [vmem:[%s2086_s3 + $0x10] ss:$8 sps:$4 sm:$0xff]   ;;  %v1461_v25 = vcombine.low %v1083_v20, %v1083_v20  ;;  %v1603_v26 = vld [vmem:[%s2085_s2 + $0x260] ss:$8 sps:$4 sm:$0xff]   ;;  %s329_s9 = scalar_lea.vmem %s2088_s5, %s1468_s6  ;;  %s318_s11 = scalar_lea.vmem %s2087_s4, %s1468_s6 }
  0x25   : > { %1003 = vmatprep.subr.bf16.mxu0 %v1528_v24  ;;  %958 = vmatprep.subr.bf16.mxu1 %v1588_v38  ;;  %v1462_v24 = vcombine.high %v1083_v20, %v1083_v20  ;;  %v1617_v30 = vld [vmem:[%s2085_s2 + $0x284] ss:$8 sps:$4 sm:$0xff]   ;;  %v1623_v33 = vld [vmem:[%s2085_s2 + $0x294] ss:$8 sps:$4 sm:$0xff]   ;;  %v1621_v34 = vld [vmem:[%s2085_s2 + $0x290] ss:$8 sps:$4 sm:$0xff]  }
  0x26   : > { %v1635_v37 = vld [vmem:[%s2085_s2 + $0x2b4] ss:$8 sps:$4 sm:$0xff]   ;;  %v1633_v38 = vld [vmem:[%s2085_s2 + $0x2b0] ss:$8 sps:$4 sm:$0xff]  }
  0x28   : > { %1004 = vmatpush1.bf16.msra.mxu0 %v1530_v27  ;;  %959 = vmatpush1.bf16.msra.mxu1 %v1590_v41  ;;  %v1611_v27 = vld [vmem:[%s2085_s2 + $0x274] ss:$8 sps:$4 sm:$0xff]  }
  0x29   : > { %1005 = vmatprep.subr.bf16.mxu0 %v1531_v28  ;;  %960 = vmatprep.subr.bf16.mxu1 %v1594_v42  ;;  %v1120_v28 = vsel %vm1118_vm0, %v1461_v25, 0  ;;  %v1650_v41 = vld [vmem:[%s2085_s2 + $0x2d4] ss:$8 sps:$4 sm:$0xff]   ;;  %v1648_v42 = vld [vmem:[%s2085_s2 + $0x2d0] ss:$8 sps:$4 sm:$0xff]  }
  0x2c   : > { %1006 = vmatpush1.bf16.msra.mxu0 %v1533_v31  ;;  %961 = vmatpush1.bf16.msra.mxu1 %v1596_v45  ;;  %v1665_v31 = vld [vmem:[%s1957_s14] sm:$0xff]   ;;  %v1660_v45 = vld [vmem:[%s2085_s2 + $0x2f4] ss:$8 sps:$4 sm:$0xff]  }
  0x2d   : > { %1007 = vmatprep.subr.bf16.mxu0 %v1534_v32  ;;  %962 = vmatprep.subr.bf16.mxu1 %v1600_v46  ;;  %v1615_v32 = vld [vmem:[%s2085_s2 + $0x280] ss:$8 sps:$4 sm:$0xff]   ;;  %v1658_v46 = vld [vmem:[%s2085_s2 + $0x2f0] ss:$8 sps:$4 sm:$0xff]  }
  0x30   : > { %1008 = vmatpush1.bf16.msra.mxu0 %v1536_v35  ;;  %963 = vmatpush1.bf16.msra.mxu1 %v1602_v49  ;;  %v1629_v35 = vld [vmem:[%s2085_s2 + $0x2a4] ss:$8 sps:$4 sm:$0xff]  }
  0x31   : > { %1009 = vmatprep.subr.bf16.mxu0 %v1537_v36  ;;  %964 = vmatprep.subr.bf16.mxu1 %v1606_v50  ;;  %v1627_v36 = vld [vmem:[%s2085_s2 + $0x2a0] ss:$8 sps:$4 sm:$0xff]  }
  0x34   : > { %1010 = vmatpush1.bf16.msra.mxu0 %v1539_v39  ;;  %965 = vmatpush1.bf16.msra.mxu1 %v1608_v53  ;;  %v1641_v39 = vld [vmem:[%s2085_s2 + $0x2c4] ss:$8 sps:$4 sm:$0xff]  }
  0x35   : > { %1011 = vmatprep.subr.bf16.mxu0 %v1540_v40  ;;  %966 = vmatprep.subr.bf16.mxu1 %v1612_v54  ;;  %v1639_v40 = vld [vmem:[%s2085_s2 + $0x2c0] ss:$8 sps:$4 sm:$0xff]  }
  0x38   : > { %1012 = vmatpush1.bf16.msra.mxu0 %v1542_v43  ;;  %967 = vmatpush1.bf16.msra.mxu1 %v1614_v58  ;;  %v1656_v43 = vld [vmem:[%s2085_s2 + $0x2e4] ss:$8 sps:$4 sm:$0xff]  }
  0x39   : > { %1013 = vmatprep.subr.bf16.mxu0 %v1546_v44  ;;  %968 = vmatprep.subr.bf16.mxu1 %v1618_v59  ;;  %v1654_v44 = vld [vmem:[%s2085_s2 + $0x2e0] ss:$8 sps:$4 sm:$0xff]  }
  0x3c   : > { %1014 = vmatpush1.bf16.msra.mxu0 %v1548_v47  ;;  %969 = vmatpush1.bf16.msra.mxu1 %v1620_v63  ;;  %v1662_v47 = vld [vmem:[%s1809_s23 + $0x10] ss:$24 sps:$4 sm:$0xff]  }
  0x3d   : > { %1015 = vmatprep.subr.bf16.mxu0 %v1552_v48  ;;  %970 = vmatprep.subr.bf16.mxu1 %v1624_v0 }
  0x40   : > { %1016 = vmatpush1.bf16.msra.mxu0 %v1554_v51  ;;  %971 = vmatpush1.bf16.msra.mxu1 %v1626_v3 }
  0x41   : > { %1017 = vmatprep.subr.bf16.mxu0 %v1558_v52  ;;  %972 = vmatprep.subr.bf16.mxu1 %v1630_v4 }
  0x44   : > { %1018 = vmatpush1.bf16.msra.mxu0 %v1560_v55  ;;  %973 = vmatpush1.bf16.msra.mxu1 %v1632_v8 }
  0x45   : > { %1030 = vmatprep.subr.bf16.mxu0 %v1569_v57  ;;  %974 = vmatprep.subr.bf16.mxu1 %v1636_v9 }
  0x47   : > { %1020 = vmatmul.mubr.bf16.vlgmr.msra.gmra.mrb[0].mxu0 %v1564_v56 }
  0x48   : > { %1031 = vmatpush1.bf16.msra.mxu0 %v1567_v61  ;;  %1062 = vmatprep.mubr.bf16.mxu0 %v1664_v5 }
  0x49   : > { %1032 = vmatprep.subr.bf16.mxu0 %v1575_v62  ;;  %975 = vmatpush1.bf16.msra.mxu1 %v1638_v12 }
  0x4a   : > { %1125 = vmatprep.subr.bf16.mxu1 %v1647_v13 }
  0x4c   : > { %1033 = vmatpush1.bf16.msra.mxu0 %v1573_v1  ;;  %977 = vmatmul.mubr.bf16.vlgmr.msra.gmra.mrb[0].mxu1 %v1642_v16 }
  0x4d   : > { %1034 = vmatprep.subr.bf16.mxu0 %v1581_v2  ;;  %1126 = vmatpush1.bf16.msra.mxu1 %v1645_v17 }
  0x4e   : > { %1157 = vmatprep.mubr.bf16.mxu1 %v1690_v23  ;;  %1127 = vmatprep.subr.bf16.mxu1 %v1653_v18 }
  0x50   : > { %1035 = vmatpush1.bf16.msra.mxu0 %v1579_v6 }
  0x51   : > { %1036 = vmatprep.subr.bf16.mxu0 %v1587_v7  ;;  %1128 = vmatpush1.bf16.msra.mxu1 %v1651_v22 }
  0x52   : > { %1463 = vmatprep.subr.msk.bf16.mxu1 %vm1118_vm0, %v1462_v24 }
  0x54   : > { %1037 = vmatpush1.bf16.msra.mxu0 %v1585_v10 }
  0x55   : > { %1038 = vmatprep.subr.bf16.mxu0 %v1593_v11  ;;  %1130 = vmatpush1.bf16.msra.mxu1 %v1120_v28 }
  0x58   : > { %1039 = vmatpush1.bf16.msra.mxu0 %v1591_v14  ;;  %1464 = vmatmul.mubr.msk.bf16.vlgmr.msra.gmra.mrb[4].mxu1 %vm1114_vm1, %v1665_v31 }
  0x59   : > { %1040 = vmatprep.subr.bf16.mxu0 %v1599_v15 }
  0x5c   : > { %1041 = vmatpush1.bf16.msra.mxu0 %v1597_v19 }
  0x5d   : > { %1042 = vmatprep.subr.bf16.mxu0 %v1605_v21 }
  0x60   : > { %1043 = vmatpush1.bf16.msra.mxu0 %v1603_v26 }
  0x61   : > { %1044 = vmatprep.subr.bf16.mxu0 %v1611_v27 }
  0x64   : > { %1045 = vmatpush1.bf16.msra.mxu0 %v1609_v29 }
  0x65   : > { %1046 = vmatprep.subr.bf16.mxu0 %v1617_v30 }
  0x68   : > { %1047 = vmatpush1.bf16.msra.mxu0 %v1615_v32 }
  0x69   : > { %1048 = vmatprep.subr.bf16.mxu0 %v1623_v33 }
  0x6c   : > { %1049 = vmatpush1.bf16.msra.mxu0 %v1621_v34 }
  0x6d   : > { %1050 = vmatprep.subr.bf16.mxu0 %v1629_v35 }
  0x70   : > { %1051 = vmatpush1.bf16.msra.mxu0 %v1627_v36 }
  0x71   : > { %1052 = vmatprep.subr.bf16.mxu0 %v1635_v37 }
  0x74   : > { %1053 = vmatpush1.bf16.msra.mxu0 %v1633_v38 }
  0x75   : > { %1054 = vmatprep.subr.bf16.mxu0 %v1641_v39 }
  0x78   : > { %1055 = vmatpush1.bf16.msra.mxu0 %v1639_v40 }
  0x79   : > { %1056 = vmatprep.subr.bf16.mxu0 %v1650_v41 }
  0x7c   : > { %1057 = vmatpush1.bf16.msra.mxu0 %v1648_v42 }
  0x7d   : > { %1058 = vmatprep.subr.bf16.mxu0 %v1656_v43 }
  0x80   : > { %1059 = vmatpush1.bf16.msra.mxu0 %v1654_v44 }
  0x81   : > { %1060 = vmatprep.subr.bf16.mxu0 %v1660_v45 }
  0x84   : > { %1061 = vmatpush1.bf16.msra.mxu0 %v1658_v46 }
  0x87   : > { %1063 = vmatmul.mubr.bf16.vlgmr.msra.gmra.mrb[0].mxu0 %v1662_v47 }
 0x11f   : > { %v978_v48 = vpop.f32.mrb[0].mxu1 }
 0x120   : > { %v980_v49 = vpop.f32.mrb[1].mxu1 }
 0x121   : > { %v982_v50 = vpop.f32.mrb[2].mxu1 }
 0x122   : > { %v984_v51 = vpop.f32.mrb[3].mxu1 }
 0x12b   : > { %v1159_v52 = vpop.f32.mrb[4].mxu1 }
 0x12c   : > { %1168 = vst [vmem:[%s329_s9] sm:$0xff] %v1159_v52  ;;  %v1161_v53 = vpop.f32.mrb[5].mxu1 }
 0x12d   : > { %1169 = vst [vmem:[%s329_s9 + $0x8] sm:$0xff] %v1161_v53  ;;  %v1163_v54 = vpop.f32.mrb[6].mxu1 }
 0x12e   : > { %1170 = vst [vmem:[%s329_s9 + $0x10] sm:$0xff] %v1163_v54  ;;  %v1165_v55 = vpop.f32.mrb[7].mxu1 }
 0x12f   : > { %1171 = vst [vmem:[%s329_s9 + $0x18] sm:$0xff] %v1165_v55 }
 0x15a   : > { %v1064_v56 = vpop.f32.mrb[0].mxu0 }
 0x15b   : > { %v1470_v57 = vadd.f32 %v1064_v56, %v978_v48  ;;  %v1066_v58 = vpop.f32.mrb[1].mxu0 }
 0x15c   : > { %v1471_v59 = vadd.f32 %v1066_v58, %v980_v49  ;;  %v1068_v60 = vpop.f32.mrb[2].mxu0 }
 0x15d   : > { %1073 = vst [vmem:[%s318_s11] sm:$0xff] %v1470_v57  ;;  %v1472_v61 = vadd.f32 %v1068_v60, %v982_v50  ;;  %v1070_v62 = vpop.f32.mrb[3].mxu0 }
 0x15e   : > { %1074 = vst [vmem:[%s318_s11 + $0x8] sm:$0xff] %v1471_v59  ;;  %v1473_v63 = vadd.f32 %v1070_v62, %v984_v51 }
 0x15f   : > { %1075 = vst [vmem:[%s318_s11 + $0x10] sm:$0xff] %v1472_v61 }
 0x160   : > { %1076 = vst [vmem:[%s318_s11 + $0x18] sm:$0xff] %v1473_v63 }
 0x161 PF: > { %s16_s20 = sadd.s32 1, %s1688_s20   ;;  %s2089_s18 = smov %s1684_s19 }
 0x162   : > { %p13_p5 = scmp.ge.s32.totalorder %s16_s20, 5   ;;  %s2090_s19 = smov %s2092_s21 }
 0x164   :  { %15 = sbr.rel (!%p13_p5) target bundleno = 2 (0x2), region = 81 }

</bundles_post_ra>
